<compile_context>
chip_gen: v6e
topology: v6e:2x2x1
jax: 0.10.0
libtpu: 0.0.40
codegen_flags: <defaults>
</compile_context>

<pallas_src>
import jax
import jax.numpy as jnp
from jax.experimental import pallas as pl
from jax.experimental.pallas import tpu as pltpu


_LANE = 128


# -----------------------------------------------------------------------------
# Kernel: fused head  out_tile = ReLU(feat @ W_rho + b_rho) @ W_fc_tile + b_fc
# -----------------------------------------------------------------------------
def _st_head_kernel(feat_ref, w1_ref, b1_ref, w2_ref, b2_ref, out_ref):
    # rho: h = ReLU(feat @ W_rho + b_rho); Dropout(p=0.25) == identity at
    # inference.  Recomputed per grid step (cheap, hides under the W_fc DMA).
    h = jnp.dot(feat_ref[...], w1_ref[...], preferred_element_type=jnp.float32)
    h = jnp.maximum(h + b1_ref[...], 0.0).astype(w2_ref.dtype)
    # fc: one lane-dense output-column tile per grid step (weight streaming,
    # f32 accumulation on the MXU).
    acc = jnp.dot(h, w2_ref[...], preferred_element_type=jnp.float32)
    out_ref[...] = (acc + b2_ref[...]).astype(out_ref.dtype)


# -----------------------------------------------------------------------------
# Tiling / VMEM helpers (per-generation sizing)
# -----------------------------------------------------------------------------
def _round_up(x, m):
    return ((x + m - 1) // m) * m


def _tpu_vmem_capacity_bytes():
    """Per-TensorCore VMEM capacity (128 MiB on v5e/v6e, 64 MiB on v7x)."""
    try:
        info = pltpu.get_tpu_info()
        cap = getattr(info, "vmem_capacity_bytes", None)
        if cap:
            return int(cap)
    except Exception:
        pass
    return 64 * 1024 * 1024  # conservative fallback (v7x-sized VMEM)


def _vmem_limit_bytes(cap):
    """Scoped-VMEM limit: most of the capacity, with compiler headroom."""
    return max(32 << 20, min(int(cap * 0.85), cap - (8 << 20)))


def _pick_fc_tile(B, D, n_pad, w_bytes, max_tile, tile_budget):
    """Output-column tile width (multiple of 128) for the W_fc weight stream."""
    # Resident blocks, conservatively counted as double-buffered (their
    # index_map is constant, so they are only DMA'd once, but the default
    # pipeliner still allocates two buffers): feat, W_rho, b_rho.
    fixed = 2 * (B * D * w_bytes + D * D * w_bytes + D * 4)
    # Per output column (double-buffered): W_fc column, b_fc, f32 out column.
    per_col = 2 * (D * w_bytes + 4 + B * 4)
    t = max((tile_budget - fixed) // per_col, _LANE)
    t = (t // _LANE) * _LANE
    t = min(t, max_tile, n_pad)
    # DMA-efficiency floor: keep >= ~1024 contiguous bf16 columns per HBM row
    # segment whenever N allows it (even if the budget formula says less).
    t = max(t, min(1024, n_pad))
    # Keep >= 2 grid steps so v7x's two TensorCores both get column tiles
    # under dimension_semantics=("parallel",); never drops below the 1024
    # floor because this branch only triggers for n_pad >= 2048.
    if n_pad >= 2048:
        t = min(t, _round_up(pl.cdiv(n_pad, 2), _LANE))
    return max(t, _LANE)


# -----------------------------------------------------------------------------
# One-time parameter preparation (hoisted out of the forward hot path)
# -----------------------------------------------------------------------------
def prepare_head_params(w_rho, b_rho, w_fc, b_fc, *, weight_dtype=jnp.bfloat16):
    """Cast head weights to the streaming dtype and pad N up to a lane multiple.

    Runs once (outside the per-call hot path).  N is padded only to a multiple
    of 128; the fc grid uses pl.cdiv so no tile-sized zero-padding is streamed.
    The b_fc zero-pad must stay coupled with the W_fc zero-pad.
    """
    D = w_rho.shape[0]
    N = w_fc.shape[1]
    n_pad = _round_up(N, _LANE)
    return {
        "w_rho": w_rho.astype(weight_dtype),
        "b_rho": b_rho.reshape(1, D).astype(jnp.float32),
        "w_fc": jnp.pad(w_fc.astype(weight_dtype), ((0, 0), (0, n_pad - N))),
        "b_fc": jnp.pad(b_fc.astype(jnp.float32), (0, n_pad - N)).reshape(1, n_pad),
    }


# -----------------------------------------------------------------------------
# Fused head forward:  out = (ReLU(feat @ W_rho + b_rho)) @ W_fc + b_fc
# -----------------------------------------------------------------------------
def st_head_forward(feat, head, num_outputs):
    """feat: [B, D] f32 -> out: [B, num_outputs] f32 via one Pallas kernel."""
    B, D = feat.shape
    w_fc = head["w_fc"]
    n_pad = w_fc.shape[1]
    weight_dtype = w_fc.dtype
    w_bytes = jnp.dtype(weight_dtype).itemsize

    cap = _tpu_vmem_capacity_bytes()
    vmem_limit = _vmem_limit_bytes(cap)
    # Larger tiles on 128 MiB-VMEM parts (v5e/v6e), capped on v7x's 64 MiB.
    max_tile_fc = 8192 if cap >= (96 << 20) else 4096
    tile_n = _pick_fc_tile(B, D, n_pad, w_bytes, max_tile_fc,
                           vmem_limit - (2 << 20))
    num_tiles = pl.cdiv(n_pad, tile_n)

    cost = pl.CostEstimate(
        flops=2 * B * D * (num_tiles * D + n_pad),
        transcendentals=0,
        bytes_accessed=(D * n_pad + D * D + B * D) * w_bytes
        + (B * n_pad + D + n_pad) * 4,
    )

    out_p = pl.pallas_call(
        _st_head_kernel,
        out_shape=jax.ShapeDtypeStruct((B, n_pad), jnp.float32),
        grid=(num_tiles,),
        in_specs=[
            pl.BlockSpec((B, D), lambda j: (0, 0)),        # feat   (resident)
            pl.BlockSpec((D, D), lambda j: (0, 0)),        # W_rho  (resident)
            pl.BlockSpec((1, D), lambda j: (0, 0)),        # b_rho  (resident)
            pl.BlockSpec((D, tile_n), lambda j: (0, j)),   # W_fc column tile
            pl.BlockSpec((1, tile_n), lambda j: (0, j)),   # b_fc column tile
        ],
        out_specs=pl.BlockSpec((B, tile_n), lambda j: (0, j)),
        compiler_params=pltpu.CompilerParams(
            dimension_semantics=("parallel",),
            vmem_limit_bytes=int(vmem_limit),
        ),
        cost_estimate=cost,
    )(feat.astype(weight_dtype), head["w_rho"], head["b_rho"],
      w_fc, head["b_fc"])

    return out_p[:, :num_outputs]


# -----------------------------------------------------------------------------
# Model wrapper (glue in plain JAX)
# -----------------------------------------------------------------------------
def st_model_forward(x, params, head):
    """x: NCHW image batch [B, C, H, W] -> logits [B, num_outputs]."""
    # TODO(synk): the real STModel uses a large pretrained backbone (resnet50 /
    # CLIP / UNI / ProvGigaPath / CONCH); replaced by a deterministic stand-in:
    # global average pool + linear projection to the backbone feature dim.
    feat = jnp.mean(x, axis=(2, 3)) @ params["w_stub"] + params["b_stub"]
    return st_head_forward(feat, head, num_outputs=params["w_fc"].shape[1])


def xavier_uniform(key, fan_in, fan_out, dtype=jnp.float32):
    limit = jnp.sqrt(6.0 / (fan_in + fan_out))
    return jax.random.uniform(key, (fan_in, fan_out), dtype=dtype,
                              minval=-limit, maxval=limit)


def init_params(key, in_ch, feat_dim, num_outputs):
    k0, k1, k2 = jax.random.split(key, 3)
    return {
        # backbone stand-in
        "w_stub": xavier_uniform(k0, in_ch, feat_dim),
        "b_stub": jnp.zeros((feat_dim,), jnp.float32),
        # rho: Linear(D, D) (xavier_uniform weight, zero bias, as in _init_weights)
        "w_rho": xavier_uniform(k1, feat_dim, feat_dim),
        "b_rho": jnp.zeros((feat_dim,), jnp.float32),
        # fc: Linear(D, num_outputs)
        "w_fc": xavier_uniform(k2, feat_dim, num_outputs),
        "b_fc": jnp.zeros((num_outputs,), jnp.float32),
    }


if __name__ == "__main__":
    # Small shapes consistent with the module's forward:
    #   x: [B, C, H, W] image batch, feature dim D (BACKBONE_DICT surrogate),
    #   num_outputs N (surrogate for 24665; deliberately NOT a multiple of 128
    #   to exercise the padded/streamed fc path).  B=16 fills a bf16 sublane
    #   tile (per the batching guidance in the review).
    B, C, H, W = 16, 4, 16, 16
    D, N = 128, 250

    key = jax.random.PRNGKey(0)
    kx, kp = jax.random.split(key)
    x = jax.random.normal(kx, (B, C, H, W), dtype=jnp.float32)
    params = init_params(kp, C, D, N)

    # One-time hoisted weight prep (bf16 cast + pad N up to a lane multiple).
    head = prepare_head_params(params["w_rho"], params["b_rho"],
                               params["w_fc"], params["b_fc"])

    fwd = jax.jit(st_model_forward)
    out = fwd(x, params, head)
    jax.block_until_ready(out)
    assert out.shape == (B, N)

    # Cross-check against a plain-JAX reference using the same bf16 weight
    # streaming / f32 accumulation the kernel uses.
    wd = jnp.bfloat16
    feat = jnp.mean(x, axis=(2, 3)) @ params["w_stub"] + params["b_stub"]
    h_ref = jnp.maximum(
        jnp.dot(feat.astype(wd), params["w_rho"].astype(wd),
                preferred_element_type=jnp.float32) + params["b_rho"], 0.0
    ).astype(wd)
    ref = jnp.dot(h_ref, params["w_fc"].astype(wd),
                  preferred_element_type=jnp.float32) + params["b_fc"]
    assert jnp.allclose(out, ref, atol=2e-2, rtol=2e-2), (
        float(jnp.max(jnp.abs(out - ref))))

    print("KERNEL_OK")
</pallas_src>

<mosaic_0001>
module attributes {stable_mosaic.version = 11 : i64} {
  func.func @_st_head_kernel(%arg0: i32, %arg1: memref<16x128xbf16, #tpu.memory_space<vmem>>, %arg2: memref<128x128xbf16, #tpu.memory_space<vmem>>, %arg3: memref<1x128xf32, #tpu.memory_space<vmem>>, %arg4: memref<128x256xbf16, #tpu.memory_space<vmem>>, %arg5: memref<1x256xf32, #tpu.memory_space<vmem>>, %arg6: memref<16x256xf32, #tpu.memory_space<vmem>>) attributes {dimension_semantics = [#tpu.dimension_semantics<parallel>], iteration_bounds = array<i64: 1>, scalar_prefetch = 0 : i64, scratch_operands = 0 : i64, tpu.core_type = #tpu.core_type<tc>, window_params = [{pipeline_mode = #tpu.pipeline_mode<synchronous>, transform_indices = @transform_0, window_bounds = array<i64: 16, 128>}, {pipeline_mode = #tpu.pipeline_mode<synchronous>, transform_indices = @transform_1, window_bounds = array<i64: 128, 128>}, {pipeline_mode = #tpu.pipeline_mode<synchronous>, transform_indices = @transform_2, window_bounds = array<i64: 1, 128>}, {transform_indices = @transform_3, window_bounds = array<i64: 128, 256>}, {transform_indices = @transform_4, window_bounds = array<i64: 1, 256>}, {transform_indices = @transform_5, window_bounds = array<i64: 16, 256>}]} {
    %c0 = arith.constant 0 : index
    %c0_0 = arith.constant 0 : index
    %0 = vector.load %arg1[%c0, %c0_0] : memref<16x128xbf16, #tpu.memory_space<vmem>>, vector<16x128xbf16>
    %c0_1 = arith.constant 0 : index
    %c0_2 = arith.constant 0 : index
    %1 = vector.load %arg2[%c0_1, %c0_2] : memref<128x128xbf16, #tpu.memory_space<vmem>>, vector<128x128xbf16>
    %cst = arith.constant dense<0.000000e+00> : vector<16x128xf32>
    %2 = tpu.matmul %0, %1, %cst {dimension_numbers = #tpu.dot_dimension_numbers<[1], [0], [0], [1], [0, 0, 1, 1], [], []>} : vector<16x128xbf16>, vector<128x128xbf16>, vector<16x128xf32> -> vector<16x128xf32>
    %c0_3 = arith.constant 0 : index
    %c0_4 = arith.constant 0 : index
    %3 = vector.load %arg3[%c0_3, %c0_4] : memref<1x128xf32, #tpu.memory_space<vmem>>, vector<1x128xf32>
    %4 = vector.broadcast %3 : vector<1x128xf32> to vector<16x128xf32>
    %5 = arith.addf %2, %4 : vector<16x128xf32>
    %cst_5 = arith.constant 0.000000e+00 : f32
    %6 = vector.broadcast %cst_5 : f32 to vector<16x128xf32>
    %7 = arith.maximumf %5, %6 : vector<16x128xf32>
    %8 = arith.truncf %7 : vector<16x128xf32> to vector<16x128xbf16>
    %c0_6 = arith.constant 0 : index
    %c0_7 = arith.constant 0 : index
    %9 = vector.load %arg4[%c0_6, %c0_7] : memref<128x256xbf16, #tpu.memory_space<vmem>>, vector<128x256xbf16>
    %cst_8 = arith.constant dense<0.000000e+00> : vector<16x256xf32>
    %10 = tpu.matmul %8, %9, %cst_8 {dimension_numbers = #tpu.dot_dimension_numbers<[1], [0], [0], [1], [0, 0, 1, 1], [], []>} : vector<16x128xbf16>, vector<128x256xbf16>, vector<16x256xf32> -> vector<16x256xf32>
    %c0_9 = arith.constant 0 : index
    %c0_10 = arith.constant 0 : index
    %11 = vector.load %arg5[%c0_9, %c0_10] : memref<1x256xf32, #tpu.memory_space<vmem>>, vector<1x256xf32>
    %12 = vector.broadcast %11 : vector<1x256xf32> to vector<16x256xf32>
    %13 = arith.addf %10, %12 : vector<16x256xf32>
    %c0_11 = arith.constant 0 : index
    %c0_12 = arith.constant 0 : index
    %14 = vector.load %arg6[%c0_11, %c0_12] : memref<16x256xf32, #tpu.memory_space<vmem>>, vector<16x256xf32>
    tpu.vector_store %arg6[%c0_11, %c0_12], %13 {strides = array<i32>} : memref<16x256xf32, #tpu.memory_space<vmem>>, vector<16x256xf32>,
    return
  }
  func.func @transform_0(%arg0: i32) -> (i32, i32) {
    %c0_i32 = arith.constant 0 : i32
    %c0_i32_0 = arith.constant 0 : i32
    %c0_i32_1 = arith.constant 0 : i32
    return %c0_i32, %c0_i32_0 : i32, i32
  }
  func.func @transform_1(%arg0: i32) -> (i32, i32) {
    %c0_i32 = arith.constant 0 : i32
    %c0_i32_0 = arith.constant 0 : i32
    %c0_i32_1 = arith.constant 0 : i32
    return %c0_i32, %c0_i32_0 : i32, i32
  }
  func.func @transform_2(%arg0: i32) -> (i32, i32) {
    %c0_i32 = arith.constant 0 : i32
    %c0_i32_0 = arith.constant 0 : i32
    %c0_i32_1 = arith.constant 0 : i32
    return %c0_i32, %c0_i32_0 : i32, i32
  }
  func.func @transform_3(%arg0: i32) -> (i32, i32) {
    %c0_i32 = arith.constant 0 : i32
    %c0_i32_0 = arith.constant 0 : i32
    return %c0_i32, %arg0 : i32, i32
  }
  func.func @transform_4(%arg0: i32) -> (i32, i32) {
    %c0_i32 = arith.constant 0 : i32
    %c0_i32_0 = arith.constant 0 : i32
    return %c0_i32, %arg0 : i32, i32
  }
  func.func @transform_5(%arg0: i32) -> (i32, i32) {
    %c0_i32 = arith.constant 0 : i32
    %c0_i32_0 = arith.constant 0 : i32
    return %c0_i32, %arg0 : i32, i32
  }
}

</mosaic_0001>

<bundles_post_ra>
// kernel: st_model_forward.1
= control target key start
LH: loop header
LB: loop body
LE: loop exit
PB: predicated region body
PF: predicated region fallthrough
CT: control target
= control target key end

     0   :  { %v432_v1 = vmov 0.0   ;;  %vm433_vm0 = vmmov 0   ;;  %s552_s0 = inlined_call_operand.vmem [shape: bf16[16,128], index: 0, kind: input, shape index: {}]   ;;  %s553_s1 = inlined_call_operand.vmem [shape: bf16[128,128], index: 1, kind: input, shape index: {}]   ;;  %s554_s2 = inlined_call_operand.vmem [shape: f32[1,128], index: 2, kind: input, shape index: {}]   ;;  %s555_s3 = inlined_call_operand.vmem [shape: bf16[128,256], index: 3, kind: input, shape index: {}]   ;;  %s556_s4 = inlined_call_operand.vmem [shape: f32[1,256], index: 4, kind: input, shape index: {}]   ;;  %s557_s5 = inlined_call_operand.hbm [shape: f32[16,256], index: 5, kind: output, shape index: {}]  }
   0x1   :  { %v377_v0 = vld [vmem:[%s553_s1 + $0x38] sm:$0xff]   ;;  %351 = vmatprep.subr.bf16.mxu0 %v432_v1  ;;  %v378_v2 = vld [vmem:[%s553_s1 + $0x30] sm:$0xff]   ;;  %367 = vmatprep.mubr.msk.bf16.mxu0 %vm433_vm0, %v432_v1  ;;  %v379_v3 = vld [vmem:[%s553_s1 + $0x28] sm:$0xff]  }
   0x2   :  { %352 = vmatpush3.bf16.msra.mxu0 %v377_v0  ;;  %v380_v4 = vld [vmem:[%s553_s1 + $0x20] sm:$0xff]   ;;  %v386_v5 = vld [vmem:[%s555_s3 + $0x74] ss:$8 sps:$4 sm:$0xff]   ;;  %v388_v6 = vld [vmem:[%s555_s3 + $0x70] ss:$8 sps:$4 sm:$0xff]  }
   0x3   :  { %353 = vmatprep.subr.bf16.mxu0 %v432_v1  ;;  %253 = vmatprep.subr.bf16.mxu1 %v386_v5  ;;  %v389_v7 = vld [vmem:[%s555_s3 + $0x64] ss:$8 sps:$4 sm:$0xff]   ;;  %v391_v8 = vld [vmem:[%s555_s3 + $0x60] ss:$8 sps:$4 sm:$0xff]   ;;  %v392_v9 = vld [vmem:[%s555_s3 + $0x54] ss:$8 sps:$4 sm:$0xff]  }
   0x4   :  { %254 = vmatpush1.bf16.msra.mxu1 %v388_v6  ;;  %v381_v10 = vld [vmem:[%s553_s1 + $0x18] sm:$0xff]   ;;  %v395_v12 = vld [vmem:[%s555_s3 + $0x44] ss:$8 sps:$4 sm:$0xff]   ;;  %v382_v13 = vld [vmem:[%s553_s1 + $0x10] sm:$0xff]  }
   0x5   :  { %255 = vmatprep.subr.bf16.mxu1 %v389_v7  ;;  %v394_v11 = vld [vmem:[%s555_s3 + $0x50] ss:$8 sps:$4 sm:$0xff]  }
   0x6   :  { %354 = vmatpush3.bf16.msra.mxu0 %v378_v2 }
   0x7   :  { %355 = vmatprep.subr.bf16.mxu0 %v432_v1 }
   0x8   :  { %256 = vmatpush1.bf16.msra.mxu1 %v391_v8 }
   0x9   :  { %257 = vmatprep.subr.bf16.mxu1 %v392_v9 }
   0xa   :  { %356 = vmatpush3.bf16.msra.mxu0 %v379_v3 }
   0xb   :  { %357 = vmatprep.subr.bf16.mxu0 %v432_v1 }
   0xe   :  { %358 = vmatpush3.bf16.msra.mxu0 %v380_v4 }
   0xf   :  { %359 = vmatprep.subr.bf16.mxu0 %v432_v1 }
  0x12   :  { %360 = vmatpush3.bf16.msra.mxu0 %v381_v10 }
  0x13   :  { %10 = vsyncpa [#allocation3], 0  ;;  %361 = vmatprep.subr.bf16.mxu0 %v432_v1  ;;  %258 = vmatpush1.bf16.msra.mxu1 %v394_v11  ;;  %v397_v14 = vld [vmem:[%s555_s3 + $0x40] ss:$8 sps:$4 sm:$0xff]   ;;  %v398_v15 = vld [vmem:[%s555_s3 + $0x34] ss:$8 sps:$4 sm:$0xff]   ;;  %v163_v37 = vlaneseq }
  0x14   :  { %259 = vmatprep.subr.bf16.mxu1 %v395_v12  ;;  %v383_v16 = vld [vmem:[%s553_s1 + $0x8] sm:$0xff]   ;;  %v400_v17 = vld [vmem:[%s555_s3 + $0x30] ss:$8 sps:$4 sm:$0xff]   ;;  %v384_v19 = vld [vmem:[%s553_s1] sm:$0xff]   ;;  %v434_v26 = vmov 0  }
  0x15   :  { %v401_v18 = vld [vmem:[%s555_s3 + $0x24] ss:$8 sps:$4 sm:$0xff]   ;;  %v403_v21 = vld [vmem:[%s555_s3 + $0x20] ss:$8 sps:$4 sm:$0xff]   ;;  %v404_v22 = vld [vmem:[%s555_s3 + $0x14] ss:$8 sps:$4 sm:$0xff]   ;;  %285 = vmatprep.mubr.bf16.mxu1 %v434_v26 }
  0x16   :  { %362 = vmatpush3.bf16.msra.mxu0 %v382_v13  ;;  %v385_v20 = vld [vmem:[%s552_s0] sm:$0xff]   ;;  %v406_v23 = vld [vmem:[%s555_s3 + $0x10] ss:$8 sps:$4 sm:$0xff]   ;;  %v164_v38 = vshrl.u32 %v163_v37, 7 }
  0x17   :  { %363 = vmatprep.subr.bf16.mxu0 %v432_v1  ;;  %260 = vmatpush1.bf16.msra.mxu1 %v397_v14  ;;  %v407_v24 = vld [vmem:[%s555_s3 + $0x4] ss:$8 sps:$4 sm:$0xff]   ;;  %v409_v25 = vld [vmem:[%s555_s3] ss:$8 sps:$4 sm:$0xff]  }
  0x18   :  { %261 = vmatprep.subr.bf16.mxu1 %v398_v15  ;;  %v316_v27 = vld [vmem:[%s554_s2] ss:$0 sm:$0xff]  ;;  %v165_v39 = vsub.s32 0, %v164_v38  ;;  %v169_v41 = vsub.s32 1, %v164_v38  ;;  %s435_s2 = smov [#allocation2]  }
  0x19   :  { %v161_v40 = vld [vmem:[%s556_s4] sm:$0x3]  ;;  %s305_s19 = sshll.u32 %s435_s2, 4  ;;  %s306_s19 = int_to_ptr.vmem [resolvable:$true] %s305_s19 }
  0x1a   :  { %364 = vmatpush3.bf16.msra.mxu0 %v383_v16  ;;  %v166_v42 = vrot.slane %v161_v40, %v165_v39  ;;  %v170_v43 = vrot.slane %v161_v40, %v169_v41  ;;  %s410_s20 = scalar_lea.vmem %s306_s19, 512  ;;  %p415_p1 = scmp.lt.s32.totalorder %s306_s19, %s306_s19 }
  0x1b   :  { %365 = vmatprep.subr.bf16.mxu0 %v432_v1  ;;  %262 = vmatpush1.bf16.msra.mxu1 %v400_v17  ;;  %p411_p0 = scmp.ne.s32.totalorder %s306_s19, %s410_s20  ;;  %p416_p2 = scmp.lt.s32.totalorder %s410_s20, %s410_s20 }
  0x1c   :  { %263 = vmatprep.subr.bf16.mxu1 %v401_v18 }
  0x1d   :  { %p417_p3 = por %p416_p2, %p415_p1 }
  0x1e   :  { %366 = vmatpush3.bf16.msra.mxu0 %v384_v19 }
  0x1f   :  { %264 = vmatpush1.bf16.msra.mxu1 %v403_v21  ;;  %p418_p4 = pnand %p417_p3, %p411_p0 }
  0x20   :  { %265 = vmatprep.subr.bf16.mxu1 %v404_v22 }
  0x21   :  { %368 = vmatmul.mubr.bf16.vlgmr.msra.gmra.mxu0 %v385_v20 }
  0x23   :  { %266 = vmatpush1.bf16.msra.mxu1 %v406_v23 }
  0x24   :  { %267 = vmatprep.subr.bf16.mxu1 %v407_v24 }
  0x27   :  { %268 = vmatpush1.bf16.msra.mxu1 %v409_v25 }
  0xe1   :  { %v135_v28 = vpop.f32.mrf.mxu0 }
  0xe2   :  { %v136_v30 = vadd.f32 %v316_v27, %v135_v28 }
  0xe3   :  { %v369_v29 = vpop.f32.mrf.mxu0 }
  0xe4   :  { %v142_v34 = vmax.f32 %v136_v30, 0.0 }
  0xe5   :  { %v138_v31 = vpop.f32.mrf.mxu0 }
  0xe6   :  { %v139_v32 = vadd.f32 %v316_v27, %v138_v31 }
  0xe7   :  { %v370_v33 = vpop.f32.mrf.mxu0 }
  0xe8   :  { %v143_v35 = vmax.f32 %v139_v32, 0.0 }
  0xea   :  { %v144_v36 = vpack.c.bf16 %v143_v35, %v142_v34 }
  0xec   :  { %286 = vmatmul.mubr.bf16.vlgmr.msra.gmra.mxu1 %v144_v36 }
 0x1ac   :  { %v287_v44 = vpop.f32.mrf.mxu1 }
 0x1ad   :  { %v288_v45 = vadd.f32 %v287_v44, %v166_v42 }
 0x1ae   :  { %v289_v46 = vpop.f32.mrf.mxu1 }
 0x1af   :  { %296 = vst [vmem:[#allocation2] sm:$0xff] %v288_v45  ;;  %v290_v47 = vadd.f32 %v289_v46, %v170_v43 }
 0x1b0   :  { %v291_v48 = vpop.f32.mrf.mxu1 }
 0x1b1   :  { %297 = vst [vmem:[#allocation2 + $0x8] sm:$0xff] %v290_v47  ;;  %v292_v49 = vadd.f32 %v291_v48, %v166_v42 }
 0x1b2   :  { %v293_v50 = vpop.f32.mrf.mxu1 }
 0x1b3   :  { %298 = vst [vmem:[#allocation2 + $0x10] sm:$0xff] %v292_v49  ;;  %v294_v51 = vadd.f32 %v293_v50, %v170_v43 }
 0x1b5   :  { %299 = vst [vmem:[#allocation2 + $0x18] sm:$0xff] %v294_v51 }
 0x1b6   :  { %421 = shalt.err (!%p418_p4)
}
 0x1b7   :  { %s436_s4 = smov 256   ;;  %s437_s21 = smov 16  }
 0x1b8   :  { %311 = dma.vmem_to_hbm [thread:$0]  %s306_s19, 512, %s557_s5, [#allocation3], %s436_s4, %s436_s4, %s437_s21  }
 0x1b9   :  { %430 = dma.done.wait [#allocation3], 512  }
 0x1ba   :  { %431 = vsyncadd [#allocation3], 4294966784 }
 0x1bb   :  { %315 = vsyncpa [#allocation3], 1 }

</bundles_post_ra>
